<compile_context>
chip_gen: v7x
topology: tpu7x:2x2x1
jax: 0.10.0
libtpu: 0.0.40
codegen_flags: <defaults>
</compile_context>

<pallas_src>
import functools

import jax
import jax.numpy as jnp
import numpy as np
from jax.experimental import pallas as pl
from jax.experimental.pallas import tpu as pltpu

_LANE = 128
_NEG_BIG = -1e30   # finite: avoids NaN for fully-masked rows


def _round_up(x, m):
    return (x + m - 1) // m * m


def _physical_vmem_bytes():
    try:
        return int(pltpu.get_tpu_info().vmem_capacity_bytes)
    except Exception:
        return 64 * 1024 * 1024   # conservative fallback: v7x per-TensorCore VMEM


def _proj_row_tile(padded_len, max_units=4):
    """Largest divisor of padded_len that is a multiple of 128 and <= 512."""
    units = padded_len // _LANE
    for u in range(min(max_units, units), 0, -1):
        if units % u == 0:
            return _LANE * u
    return _LANE


def _split_rows_for_megacore(batch, lx, t_lx):
    # v7x has two TensorCores: make sure the parallel grid axes expose >= 2
    # steps so megacore sharding has work for both cores.
    if batch == 1 and (lx + t_lx - 1) // t_lx < 2:
        lx128 = _round_up(lx, _LANE)
        if lx128 >= 2 * _LANE:
            t_lx = max(_LANE, (lx128 // 2) // _LANE * _LANE)
    return t_lx


def _attn_vmem_estimate(t_lx, t_ly, dp, single_pass):
    """Rough per-step VMEM footprint (double-buffered blocks + f32 temporaries)."""
    bf2, f4 = 2, 4
    x_blk = 2 * t_lx * dp * bf2           # x_proj tile (bf16, double buffered)
    y_blk = 2 * 2 * t_ly * dp * bf2       # y_proj + Y values tiles
    o_blk = 2 * t_lx * dp * f4            # f32 output / accumulator tile
    bias_blk = 2 * t_ly * f4              # additive column bias
    tmp = 3 * t_lx * t_ly * f4            # scores / exp temporaries
    scratch = 0 if single_pass else 2 * t_lx * f4
    return x_blk + y_blk + o_blk + bias_blk + tmp + scratch


def _pick_attention_tiles(batch, lx, ly, dp, plan_budget,
                          prefer_resident_y, block_x_max, block_y_max):
    lx128 = _round_up(max(lx, 1), _LANE)
    ly128 = _round_up(max(ly, 1), _LANE)

    # Path A: whole (padded) Y resident in VMEM, single-pass softmax.
    if prefer_resident_y:
        t_lx = _split_rows_for_megacore(batch, lx, min(256, block_x_max, lx128))
        if _attn_vmem_estimate(t_lx, ly128, dp, True) <= plan_budget:
            return t_lx, ly128, True

    # Path B: flash / online softmax.  Y is re-streamed per Lx tile, so keep
    # t_lx large (arithmetic intensity ~ t_lx) and shrink t_ly first.
    t_lx = _split_rows_for_megacore(batch, lx, min(block_x_max, lx128))
    t_ly = min(block_y_max, ly128)
    while t_ly > _LANE and _attn_vmem_estimate(t_lx, t_ly, dp, False) > plan_budget:
        t_ly -= _LANE
    while t_lx > _LANE and _attn_vmem_estimate(t_lx, t_ly, dp, False) > plan_budget:
        t_lx -= _LANE
    return t_lx, t_ly, False


# ---------------------------------------------------------------------------
# Kernel 1: shared linear + ReLU projection, tiled over rows.
# ---------------------------------------------------------------------------
def _proj_relu_kernel(x_ref, w_ref, b_ref, o_ref):
    # x_ref: (1, tR, Dp) bf16, w_ref: (Dp, Dp) bf16 (VMEM-resident),
    # b_ref: (1, Dp) f32 (VMEM-resident).
    acc = jnp.dot(x_ref[0], w_ref[...], preferred_element_type=jnp.float32)
    o_ref[0] = jnp.maximum(acc + b_ref[...], 0.0).astype(o_ref.dtype)


def _project(x3, w, b, t_rows, vmem_limit):
    B, L, Dp = x3.shape
    return pl.pallas_call(
        _proj_relu_kernel,
        out_shape=jax.ShapeDtypeStruct((B, L, Dp), jnp.bfloat16),
        grid=(B, L // t_rows),
        in_specs=[
            pl.BlockSpec((1, t_rows, Dp), lambda b, r: (b, r, 0)),
            # Whole weight / bias resident in VMEM for the entire grid:
            # one copy, DMA'd once, no per-step re-fetch or double buffer.
            pl.BlockSpec(memory_space=pltpu.MemorySpace.VMEM),
            pl.BlockSpec(memory_space=pltpu.MemorySpace.VMEM),
        ],
        out_specs=pl.BlockSpec((1, t_rows, Dp), lambda b, r: (b, r, 0)),
        compiler_params=pltpu.CompilerParams(
            dimension_semantics=("parallel", "parallel"),
            vmem_limit_bytes=vmem_limit),
    )(x3, w, b)


# ---------------------------------------------------------------------------
# Kernel 2a: Y-resident single-pass softmax attention (grid = (B, Lx tiles)).
# ---------------------------------------------------------------------------
def _attn_single_kernel(*refs, has_bias):
    if has_bias:
        x_ref, yp_ref, yv_ref, bias_ref, o_ref = refs
    else:
        x_ref, yp_ref, yv_ref, o_ref = refs
        bias_ref = None

    x = x_ref[0]       # (tLx, Dp) bf16
    yp = yp_ref[0]     # (Lyp, Dp) bf16, resident across the Lx axis
    yv = yv_ref[0]     # (Lyp, Dp) bf16

    # scores_{ik} = <x_proj_i, y_proj_k>; contracting dims last -> no transpose.
    s = jax.lax.dot_general(
        x, yp, dimension_numbers=(((1,), (1,)), ((), ())),
        preferred_element_type=jnp.float32)            # (tLx, Lyp) f32
    if has_bias:
        s = s + bias_ref[0]                            # -1e30 on invalid columns

    m = jnp.max(s, axis=-1, keepdims=True)
    p = jnp.exp(s - m)
    l = jnp.sum(p, axis=-1, keepdims=True)             # >= 1, reciprocal safe
    pv = jnp.dot(p.astype(jnp.bfloat16), yv, preferred_element_type=jnp.float32)
    o_ref[0] = (pv * pl.reciprocal(l, approx=True)).astype(o_ref.dtype)


# ---------------------------------------------------------------------------
# Kernel 2b: flash-style fallback with online softmax over Ly tiles.
# The f32 output block doubles as the running numerator (resident across j).
# ---------------------------------------------------------------------------
def _attn_flash_kernel(*refs, has_bias):
    if has_bias:
        x_ref, yp_ref, yv_ref, bias_ref, o_ref, m_ref, l_ref = refs
    else:
        x_ref, yp_ref, yv_ref, o_ref, m_ref, l_ref = refs
        bias_ref = None

    j = pl.program_id(2)

    @pl.when(j == 0)
    def _init():
        m_ref[...] = jnp.full_like(m_ref, -jnp.inf)
        l_ref[...] = jnp.zeros_like(l_ref)
        o_ref[...] = jnp.zeros_like(o_ref)     # output block is the accumulator

    x = x_ref[0]       # (tLx, Dp) bf16
    yp = yp_ref[0]     # (tLy, Dp) bf16
    yv = yv_ref[0]     # (tLy, Dp) bf16

    s = jax.lax.dot_general(
        x, yp, dimension_numbers=(((1,), (1,)), ((), ())),
        preferred_element_type=jnp.float32)            # (tLx, tLy) f32
    if has_bias:
        s = s + bias_ref[0]

    m_prev = m_ref[...]
    m_new = jnp.maximum(m_prev, jnp.max(s, axis=-1, keepdims=True))
    corr = jnp.exp(m_prev - m_new)                     # exactly 0 on first tile
    p = jnp.exp(s - m_new)
    l_ref[...] = corr * l_ref[...] + jnp.sum(p, axis=-1, keepdims=True)
    o_ref[0] = corr * o_ref[0] + jnp.dot(
        p.astype(jnp.bfloat16), yv, preferred_element_type=jnp.float32)
    m_ref[...] = m_new

    @pl.when(j == pl.num_programs(2) - 1)
    def _finalize():
        o_ref[0] = o_ref[0] * pl.reciprocal(l_ref[...], approx=True)


# ---------------------------------------------------------------------------
# Wrapper
# ---------------------------------------------------------------------------
def seq_attention(X, Y, Y_mask, W, bias, *, apply_mask=False,
                  prefer_resident_y=True, block_x_max=512, block_y_max=512):
    """Pallas implementation of seqAttention.forward.

    X: (B, Lx, D), Y: (B, Ly, D), Y_mask: (B, Ly) with 1/True == padded,
    W: (D, D) PyTorch nn.Linear weight (out_features, in_features), bias: (D,).

    apply_mask=False (default) reproduces the PyTorch reference exactly (its
    out-of-place masked_fill is discarded); apply_mask=True folds the mask into
    the softmax.  NOTE: with apply_mask=True, a row whose real columns are all
    masked softmaxes uniformly over the padded Ly length (degenerate case).
    """
    B, Lx, D = X.shape
    _, Ly, _ = Y.shape
    f32, bf16 = jnp.float32, jnp.bfloat16

    Dp = _round_up(D, _LANE)                       # lane-dense last dim

    phys = _physical_vmem_bytes()
    plan_budget = int(phys * 0.70)                 # leave headroom for internals
    vmem_limit = int(phys * 0.85)                  # > v5e's 16 MiB scoped default

    t_lx, t_ly, resident_y = _pick_attention_tiles(
        B, Lx, Ly, Dp, plan_budget, prefer_resident_y, block_x_max, block_y_max)
    Lxp = _round_up(Lx, t_lx)
    Lyp = _round_up(Ly, t_ly)

    # PyTorch weight is (out, in): transpose to (in, out), then zero-pad so the
    # padded hidden dims project to exactly 0 (bias padding is 0 too).
    w_pad = jnp.pad(W.astype(f32).T, ((0, Dp - D), (0, Dp - D))).astype(bf16)
    b_pad = jnp.pad(bias.astype(f32), (0, Dp - D)).reshape(1, Dp)

    x_pad = jnp.pad(X.astype(bf16), ((0, 0), (0, Lxp - Lx), (0, Dp - D)))
    y_pad = jnp.pad(Y.astype(bf16), ((0, 0), (0, Lyp - Ly), (0, Dp - D)))

    # Hoisted projections: each Y tile is projected once, not once per Lx tile.
    x_proj = _project(x_pad, w_pad, b_pad, _proj_row_tile(Lxp), vmem_limit)
    y_proj = _project(y_pad, w_pad, b_pad, _proj_row_tile(Lyp), vmem_limit)

    # Additive column bias (0 on valid columns, -1e30 on masked / padded ones).
    need_bias = apply_mask or (Lyp != Ly)
    operands = [x_proj, y_proj, y_pad]
    bias_cols = None
    if need_bias:
        invalid = (jnp.arange(Lyp) >= Ly)[None, :]                   # (1, Lyp)
        if apply_mask:
            invalid = invalid | jnp.pad(Y_mask.astype(bool),
                                        ((0, 0), (0, Lyp - Ly)),
                                        constant_values=True)
        invalid = jnp.broadcast_to(invalid, (B, Lyp))
        bias_cols = jnp.where(invalid, jnp.float32(_NEG_BIG),
                              jnp.float32(0.0)).reshape(B, 1, Lyp)
        operands.append(bias_cols)

    if resident_y:
        # Single-pass softmax: Y blocks are constant across the Lx axis, so
        # they stay VMEM-resident and are only re-DMA'd when b changes.
        in_specs = [
            pl.BlockSpec((1, t_lx, Dp), lambda b, i: (b, i, 0)),
            pl.BlockSpec((1, Lyp, Dp), lambda b, i: (b, 0, 0)),
            pl.BlockSpec((1, Lyp, Dp), lambda b, i: (b, 0, 0)),
        ]
        if need_bias:
            in_specs.append(pl.BlockSpec((1, 1, Lyp), lambda b, i: (b, 0, 0)))
        out = pl.pallas_call(
            functools.partial(_attn_single_kernel, has_bias=need_bias),
            out_shape=jax.ShapeDtypeStruct((B, Lxp, Dp), jnp.float32),
            grid=(B, Lxp // t_lx),
            in_specs=in_specs,
            out_specs=pl.BlockSpec((1, t_lx, Dp), lambda b, i: (b, i, 0)),
            compiler_params=pltpu.CompilerParams(
                dimension_semantics=("parallel", "parallel"),
                vmem_limit_bytes=vmem_limit),
        )(*operands)
    else:
        # Flash fallback: reduction (Ly) axis last and "arbitrary".
        in_specs = [
            pl.BlockSpec((1, t_lx, Dp), lambda b, i, j: (b, i, 0)),
            pl.BlockSpec((1, t_ly, Dp), lambda b, i, j: (b, j, 0)),
            pl.BlockSpec((1, t_ly, Dp), lambda b, i, j: (b, j, 0)),
        ]
        if need_bias:
            in_specs.append(pl.BlockSpec((1, 1, t_ly), lambda b, i, j: (b, 0, j)))
        out = pl.pallas_call(
            functools.partial(_attn_flash_kernel, has_bias=need_bias),
            out_shape=jax.ShapeDtypeStruct((B, Lxp, Dp), jnp.float32),
            grid=(B, Lxp // t_lx, Lyp // t_ly),
            in_specs=in_specs,
            out_specs=pl.BlockSpec((1, t_lx, Dp), lambda b, i, j: (b, i, 0)),
            scratch_shapes=[
                pltpu.VMEM((t_lx, 1), jnp.float32),   # running max
                pltpu.VMEM((t_lx, 1), jnp.float32),   # running denominator
            ],
            compiler_params=pltpu.CompilerParams(
                dimension_semantics=("parallel", "parallel", "arbitrary"),
                vmem_limit_bytes=vmem_limit),
        )(*operands)

    return out[:, :Lx, :D]


def _reference(X, Y, Y_mask, W, bias, apply_mask=False):
    # Pure-JAX f32 reference mirroring the PyTorch forward exactly.
    x_proj = jax.nn.relu(X @ W.T + bias)
    y_proj = jax.nn.relu(Y @ W.T + bias)
    scores = jnp.einsum("bxd,byd->bxy", x_proj, y_proj)
    if apply_mask:  # reference's masked_fill is out-of-place => no-op by default
        scores = jnp.where(Y_mask[:, None, :], _NEG_BIG, scores)
    alpha = jax.nn.softmax(scores, axis=-1)
    return jnp.einsum("bxy,byd->bxd", alpha, Y)


if __name__ == "__main__":
    key = jax.random.PRNGKey(0)

    configs = [
        # (B, Lx, Ly, D, apply_mask, extra kwargs)
        dict(B=2, Lx=8,   Ly=12,  D=32, apply_mask=False, kw={}),   # resident-Y
        dict(B=2, Lx=8,   Ly=12,  D=32, apply_mask=True,  kw={}),   # resident-Y + mask
        dict(B=2, Lx=8,   Ly=128, D=32, apply_mask=False, kw={}),   # resident-Y, no bias
        dict(B=2, Lx=40,  Ly=300, D=32, apply_mask=False,           # flash path
             kw=dict(prefer_resident_y=False, block_y_max=128)),
        dict(B=2, Lx=40,  Ly=300, D=32, apply_mask=True,            # flash + mask
             kw=dict(prefer_resident_y=False, block_y_max=128)),
        dict(B=1, Lx=300, Ly=256, D=32, apply_mask=False,           # flash, no bias,
             kw=dict(prefer_resident_y=False, block_y_max=128)),    # megacore split
    ]

    for cfg in configs:
        kx, ky, km, kwt, kb, key = jax.random.split(key, 6)
        B, Lx, Ly, D = cfg["B"], cfg["Lx"], cfg["Ly"], cfg["D"]

        X = jax.random.normal(kx, (B, Lx, D), dtype=jnp.float32)
        Y = jax.random.normal(ky, (B, Ly, D), dtype=jnp.float32)
        Y_mask = jax.random.uniform(km, (B, Ly)) < 0.25              # bool padding mask
        W = 0.1 * jax.random.normal(kwt, (D, D), dtype=jnp.float32)  # (out, in)
        bias = 0.1 * jax.random.normal(kb, (D,), dtype=jnp.float32)

        out = jax.block_until_ready(
            seq_attention(X, Y, Y_mask, W, bias,
                          apply_mask=cfg["apply_mask"], **cfg["kw"]))
        ref = _reference(X, Y, Y_mask, W, bias, apply_mask=cfg["apply_mask"])
        # bf16 MXU operands + approximate reciprocal => loosened tolerance vs f32.
        np.testing.assert_allclose(np.asarray(out), np.asarray(ref),
                                   rtol=5e-2, atol=5e-2)

    print("KERNEL_OK")
</pallas_src>

<mosaic_0001>
module attributes {stable_mosaic.version = 11 : i64} {
  func.func @_proj_relu_kernel(%arg0: i32, %arg1: i32, %arg2: memref<1x128x128xbf16, #tpu.memory_space<vmem>>, %arg3: memref<128x128xbf16, #tpu.memory_space<vmem>>, %arg4: memref<1x128xf32, #tpu.memory_space<vmem>>, %arg5: memref<1x128x128xbf16, #tpu.memory_space<vmem>>) attributes {dimension_semantics = [#tpu.dimension_semantics<parallel>, #tpu.dimension_semantics<parallel>], iteration_bounds = array<i64: 2, 1>, scalar_prefetch = 0 : i64, scratch_operands = 0 : i64, tpu.core_type = #tpu.core_type<tc>, window_params = [{transform_indices = @transform_0, window_bounds = array<i64: 1, 128, 128>}, {pipeline_mode = #tpu.pipeline_mode<synchronous>, transform_indices = @transform_1, window_bounds = array<i64: 128, 128>}, {pipeline_mode = #tpu.pipeline_mode<synchronous>, transform_indices = @transform_2, window_bounds = array<i64: 1, 128>}, {transform_indices = @transform_3, window_bounds = array<i64: 1, 128, 128>}]} {
    %c0 = arith.constant 0 : index
    %c0_0 = arith.constant 0 : index
    %c0_1 = arith.constant 0 : index
    %0 = vector.load %arg2[%c0, %c0_0, %c0_1] : memref<1x128x128xbf16, #tpu.memory_space<vmem>>, vector<1x128x128xbf16>
    %1 = vector.shape_cast %0 : vector<1x128x128xbf16> to vector<128x128xbf16>
    %c0_2 = arith.constant 0 : index
    %c0_3 = arith.constant 0 : index
    %2 = vector.load %arg3[%c0_2, %c0_3] : memref<128x128xbf16, #tpu.memory_space<vmem>>, vector<128x128xbf16>
    %cst = arith.constant dense<0.000000e+00> : vector<128x128xf32>
    %3 = tpu.matmul %1, %2, %cst {dimension_numbers = #tpu.dot_dimension_numbers<[1], [0], [0], [1], [0, 0, 1, 1], [], []>} : vector<128x128xbf16>, vector<128x128xbf16>, vector<128x128xf32> -> vector<128x128xf32>
    %c0_4 = arith.constant 0 : index
    %c0_5 = arith.constant 0 : index
    %4 = vector.load %arg4[%c0_4, %c0_5] : memref<1x128xf32, #tpu.memory_space<vmem>>, vector<1x128xf32>
    %5 = vector.broadcast %4 : vector<1x128xf32> to vector<128x128xf32>
    %6 = arith.addf %3, %5 : vector<128x128xf32>
    %cst_6 = arith.constant 0.000000e+00 : f32
    %7 = vector.broadcast %cst_6 : f32 to vector<128x128xf32>
    %8 = arith.maximumf %6, %7 : vector<128x128xf32>
    %9 = arith.truncf %8 : vector<128x128xf32> to vector<128x128xbf16>
    %c0_7 = arith.constant 0 : index
    %c0_8 = arith.constant 0 : index
    %c0_9 = arith.constant 0 : index
    %10 = vector.load %arg5[%c0_7, %c0_8, %c0_9] : memref<1x128x128xbf16, #tpu.memory_space<vmem>>, vector<1x128x128xbf16>
    %11 = vector.shape_cast %10 : vector<1x128x128xbf16> to vector<128x128xbf16>
    %12 = vector.shape_cast %9 : vector<128x128xbf16> to vector<1x128x128xbf16>
    tpu.vector_store %arg5[%c0_7, %c0_8, %c0_9], %12 {strides = array<i32>} : memref<1x128x128xbf16, #tpu.memory_space<vmem>>, vector<1x128x128xbf16>,
    return
  }
  func.func @transform_0(%arg0: i32, %arg1: i32) -> (i32, i32, i32) {
    %c0_i32 = arith.constant 0 : i32
    %c0_i32_0 = arith.constant 0 : i32
    return %arg0, %arg1, %c0_i32 : i32, i32, i32
  }
  func.func @transform_1(%arg0: i32, %arg1: i32) -> (i32, i32) {
    %c0_i32 = arith.constant 0 : i32
    %c0_i32_0 = arith.constant 0 : i32
    %c0_i32_1 = arith.constant 0 : i32
    return %c0_i32, %c0_i32_0 : i32, i32
  }
  func.func @transform_2(%arg0: i32, %arg1: i32) -> (i32, i32) {
    %c0_i32 = arith.constant 0 : i32
    %c0_i32_0 = arith.constant 0 : i32
    %c0_i32_1 = arith.constant 0 : i32
    return %c0_i32, %c0_i32_0 : i32, i32
  }
  func.func @transform_3(%arg0: i32, %arg1: i32) -> (i32, i32, i32) {
    %c0_i32 = arith.constant 0 : i32
    %c0_i32_0 = arith.constant 0 : i32
    return %arg0, %arg1, %c0_i32 : i32, i32, i32
  }
}

</mosaic_0001>

<bundles_post_ra>
// kernel: tpu_custom_call.1
= control target key start
LH: loop header
LB: loop body
LE: loop exit
PB: predicated region body
PF: predicated region fallthrough
CT: control target
= control target key end

     0   :  { %8 = vsyncpa [#allocation3], 0  ;;  %s1364_s0 = inlined_call_operand.hbm [shape: bf16[2,128,128], index: 0, kind: input, shape index: {}]   ;;  %s1365_s1 = inlined_call_operand.hbm [shape: bf16[128,128], index: 1, kind: input, shape index: {}]   ;;  %s1366_s2 = inlined_call_operand.vmem [shape: f32[1,128], index: 2, kind: input, shape index: {}]   ;;  %s1367_s3 = inlined_call_operand.hbm [shape: bf16[2,128,128], index: 3, kind: output, shape index: {}]  }
   0x1   :  { %10 = vsyncpa [#allocation3 + $0x1], 0 }
   0x2   :  { %11 = vsyncpa [#allocation6], 0 }
   0x3   :  { %12 = vsyncpa [#allocation4], 0 }
   0x4   :  { %14 = vsyncpa [#allocation4 + $0x1], 0  ;;  %s1111_s12 = smov 0   ;;  %s1113_s13 = smov 0  }
   0x5   :  { %s1115_s14 = smov 0   ;;  %s1117_s15 = smov 0  }
   0x6   :  { %s1119_s16 = smov 0   ;;  %s1121_s17 = smov 0  }
   0x7 LB: > { %s666_s18 = sadd.s32 4294967295, %s1082_s17   ;;  %s667_s19 = sadd.s32 4294967294, %s1082_s17   ;;  %s1082_s17 = sphi %s1121_s17, %s20_s17   ;;  %s1078_s16 = sphi %s1119_s16, %s1391_s16   ;;  %s1074_s15 = sphi %s1117_s15, %s1390_s15   ;;  %s1070_s14 = sphi %s1115_s14, %s1389_s14   ;;  %s1066_s13 = sphi %s1113_s13, %s1388_s13   ;;  %s1062_s12 = sphi %s1111_s12, %s1387_s12  }
   0x8   : > { %p54_p0 = scmp.ne.s32.totalorder %s1066_s13, %s1062_s12  ;;  %p1145_p1 = scmp.eq.s32.totalorder %s666_s18, 0 }
   0x9   : > { %p1149_p2 = scmp.eq.s32.totalorder %s666_s18, 1  ;;  %p128_p3 = scmp.eq.s32.totalorder %s667_s19, 1 }
   0xa   : > { %s1372_s20 = scalar_select %p1145_p1, 1, 0 }
   0xb   : > { %s1373_s21 = scalar_select %p1149_p2, 1, 0 }
   0xc   : > { %p1155_p4 = por %p1145_p1, %p54_p0  ;;  %p668_p5 = scmp.ge.s32.totalorder %s1082_s17, 1 }
   0xd   : > { %p1160_p6 = por %p128_p3, %p54_p0  ;;  %p135_p7 = scmp.lt.s32.totalorder %s1082_s17, 3 }
   0xe   : > { %s1374_s22 = scalar_select %p1155_p4, 1, 0 }
   0xf   : > { %s1375_s23 = scalar_select %p1160_p6, 1, 0 }
  0x10   : > { %p1165_p8 = pnand %p668_p5, %p135_p7  ;;  %s1084_s25 = smov [#allocation5]  }
  0x11   : > { %s147_s26 = sshll.u32 %s1084_s25, 4  ;;  %s32_s28 = sadd.s32 1, %s1078_s16  ;;  %s148_s26 = int_to_ptr.vmem [resolvable:$true] %s147_s26 }
  0x12   : > { %s1376_s24 = scalar_select %p1165_p8, 1, 0 }
  0x13   : > { %p853_p9 = pneg %p1165_p8  ;;  %s938_s4 = scalar_lea.hbm %s1365_s1, 1024 }
  0x14   : > { %p939_p12 = scmp.ne.s32.totalorder %s1365_s1, %s938_s4  ;;  %p945_p5 = scmp.lt.u32.totalorder %s938_s4, %s1365_s1 }
  0x15   : > { %p1174_p11 = pnand %p853_p9, %p1145_p1 }
  0x17   : > { %p940_p13 = pneg %p1174_p11 }
  0x19   : > { %p941_p0 = pnand %p940_p13, %p939_p12 }
  0x1b   : > { %p942_p3 = pneg %p941_p0 }
  0x1d   : > { %p947_p7 = pnand %p945_p5, %p942_p3 }
  0x1f   : > { %950 = shalt.err (!%p947_p7)
}
  0x20   : > { %s951_s9 = scalar_lea.vmem %s148_s26, 1024  ;;  %p959_p1 = scmp.lt.s32.totalorder %s148_s26, %s148_s26 }
  0x21   : > { %p952_p9 = scmp.ne.s32.totalorder %s148_s26, %s951_s9  ;;  %p960_p4 = scmp.lt.s32.totalorder %s951_s9, %s951_s9 }
  0x23   : > { %p954_p10 = pnand %p952_p9, %p940_p13  ;;  %p961_p8 = por %p960_p4, %p959_p1 }
  0x25   : > { %p955_p6 = pneg %p954_p10 }
  0x27   : > { %p962_p2 = pnand %p961_p8, %p955_p6 }
  0x29   : > { %965 = shalt.err (!%p962_p2)
}
  0x2a   : > { %s1085_s10 = smov 64   ;;  %s1086_s11 = smov 4  }
  0x2b   : > { %856 = dma.hbm_to_vmem [thread:$0]  (!%p1174_p11), %s1365_s1, 1024, %s148_s26, [#allocation6], %s1085_s10, %s1085_s10, %s1086_s11  }
  0x2c   : > { %p34_p1 = scmp.ge.s32.totalorder %s32_s28, 2  ;;  %s41_s25 = sadd.s32 1, %s1070_s14 }
  0x2d   : > { %p48_p2 = scmp.ne.s32.totalorder %s1070_s14, %s1066_s13  ;;  %p49_p4 = scmp.eq.s32.totalorder %s1082_s17, 0 }
  0x2e   : > { %s1393_s28 = smov (%p34_p1, %s32_s28), 0  ;;  %p1379_p8 = scmp.ne.s32.totalorder %s1373_s21, 0 }
  0x2f   : > { %p1204_p6 = por %p49_p4, %p48_p2  ;;  %s36_s30 = ssub.s32 %s1078_s16, %s1393_s28 }
  0x30   : > { %p1210_p10 = por %p1379_p8, %p48_p2  ;;  %p866_p12 = scmp.lt.s32.totalorder %s1082_s17, 2 }
  0x31   : > { %p39_p11 = scmp.eq.s32.totalorder %s36_s30, 0  ;;  %s164_s26 = sand.u32 1, %s1070_s14  }
  0x32   : > { %s671_s4 = sshll.u32 %s164_s26, 6  ;;  %s716_s6 = sshll.u32 %s1078_s16, 10 }
  0x33   : > { %s1219_s5 = scalar_select %p39_p11, %s1070_s14, %s41_s25  }
  0x34   : > { %s1225_s9 = scalar_lea.hbm %s1364_s0, %s716_s6  ;;  %s168_s21 = scalar_lea.vmem [#allocation2], %s671_s4 }
  0x35   : > { %s177_s18 = sshll.u32 %s168_s21, 4  ;;  %p1231_p13 = pnand %p866_p12, %p1204_p6  ;;  %s1227_s18 = int_to_ptr.vmem [resolvable:$true] %s177_s18 }
  0x36   : > { %s1235_s25 = scalar_lea.sflag [#allocation3], %s164_s26  ;;  %s966_s30 = scalar_lea.hbm %s1225_s9, 1024 }
  0x37   : > { %p967_p0 = scmp.ne.s32.totalorder %s1225_s9, %s966_s30  ;;  %p968_p3 = pneg %p1231_p13 }
  0x38   : > { %s971_s29 = scalar_lea.hbm %s1364_s0, 2048  ;;  %p972_p9 = scmp.lt.u32.totalorder %s1225_s9, %s1364_s0 }
  0x39   : > { %p969_p5 = pnand %p968_p3, %p967_p0  ;;  %p973_p1 = scmp.lt.u32.totalorder %s971_s29, %s966_s30 }
  0x3a   : > { %p975_p4 = scmp.lt.u32.totalorder %s966_s30, %s1225_s9 }
  0x3b   : > { %p970_p7 = pneg %p969_p5  ;;  %p974_p2 = por %p973_p1, %p972_p9 }
  0x3d   : > { %p976_p6 = por %p975_p4, %p974_p2 }
  0x3f   : > { %p977_p8 = pnand %p976_p6, %p970_p7 }
  0x41   : > { %980 = shalt.err (!%p977_p8)
}
  0x42   : > { %s981_s26 = scalar_lea.vmem %s1227_s18, 1024  ;;  %s1087_s21 = smov [#allocation2]  }
  0x43   : > { %p982_p12 = scmp.ne.s32.totalorder %s1227_s18, %s981_s26  ;;  %s986_s4 = sshll.u32 %s1087_s21, 4  ;;  %s987_s4 = int_to_ptr.vmem [resolvable:$false] %s986_s4 }
  0x44   : > { %s988_s6 = scalar_lea.vmem %s987_s4, 2048  ;;  %p989_p5 = scmp.lt.s32.totalorder %s1227_s18, %s987_s4 }
  0x45   : > { %p984_p11 = pnand %p982_p12, %p968_p3  ;;  %p990_p9 = scmp.lt.s32.totalorder %s988_s6, %s981_s26 }
  0x47   : > { %p985_p0 = pneg %p984_p11  ;;  %p991_p1 = por %p990_p9, %p989_p5 }
  0x49   : > { %p992_p2 = pnand %p991_p1, %p985_p0 }
  0x4b   : > { %995 = shalt.err (!%p992_p2)
}
  0x4c   : > { %860 = dma.hbm_to_vmem [thread:$0]  (!%p1231_p13), %s1225_s9, 1024, %s1227_s18, %s1235_s25, %s1085_s10, %s1085_s10, %s1086_s11  }
  0x4d   : > { %p1382_p3 = scmp.ne.s32.totalorder %s1376_s24, 0 }
  0x4e   : > { %s1269_s30 = sand.u32 (!%p1382_p3), 1, %s1066_s13   ;;  %p1383_p7 = scmp.ne.s32.totalorder (!%p1382_p3), %s1374_s22, 0 }
  0x4f   : > { %189 = sbr.rel (%p1382_p3) target bundleno = 367 (0x16f), region = 32  ;;  %s675_s29 = sshll.u32 (!%p1382_p3), %s1269_s30, 6 }
  0x50   : > { %s192_s7 = scalar_lea.sflag (!%p1382_p3), [#allocation3], %s1269_s30  ;;  %s1275_s19 = scalar_lea.vmem (!%p1382_p3), [#allocation2], %s675_s29 }
  0x56   : > { %1049 = dma.done.wait (%p1383_p7), %s192_s7, 1024  }
  0x57   : > { %1051 = vsyncadd (%p1383_p7), %s192_s7, 4294966272  ;;  %p1384_p13 = scmp.ne.s32.totalorder %s1372_s20, 0 }
  0x59   : > { %1053 = dma.done.wait (%p1384_p13), [#allocation6], 1024  }
  0x5a   : > { %1055 = vsyncadd (%p1384_p13), [#allocation6], 4294966272  ;;  %v922_v0 = vld [vmem:[#allocation5] sm:$0xff]   ;;  %v923_v1 = vld [vmem:[#allocation5 + $0x8] sm:$0xff]   ;;  %s1298_s24 = scalar_lea.vmem [#allocation7], %s675_s29  ;;  %s733_s11 = sshll.u32 %s1074_s15, 10 }
  0x5b   : > { %797 = vmatprep.subr.bf16.mxu0 %v922_v0  ;;  %829 = vmatprep.subr.bf16.mxu1 %v922_v0  ;;  %v924_v2 = vld [vmem:[#allocation5 + $0x10] sm:$0xff]   ;;  %v925_v3 = vld [vmem:[#allocation5 + $0x18] sm:$0xff]   ;;  %v930_v4 = vld [vmem:[%s1275_s19] sm:$0xff]   ;;  %s569_s10 = sshll.u32 %s1298_s24, 4  ;;  %s1311_s18 = scalar_lea.hbm %s1367_s3, %s733_s11  ;;  %s1306_s10 = int_to_ptr.vmem [resolvable:$true] %s569_s10 }
  0x5c   : > { %798 = vmatpush3.bf16.msra.mxu0 %v922_v0  ;;  %837 = vmatpush3.bf16.msra.mxu1 %v922_v0  ;;  %v931_v5 = vld [vmem:[%s1275_s19 + $0x20] sm:$0xff]   ;;  %v927_v7 = vld [vmem:[#allocation5 + $0x28] sm:$0xff]   ;;  %v928_v8 = vld [vmem:[#allocation5 + $0x30] sm:$0xff]   ;;  %s554_s25 = scalar_lea.sflag [#allocation4], %s1269_s30  ;;  %s996_s8 = scalar_lea.vmem %s1306_s10, 1024 }
  0x5d   : > { %799 = vmatprep.subr.bf16.mxu0 %v923_v1  ;;  %830 = vmatprep.subr.bf16.mxu1 %v923_v1  ;;  %v926_v6 = vld [vmem:[#allocation5 + $0x20] sm:$0xff]   ;;  %v929_v9 = vld [vmem:[#allocation5 + $0x38] sm:$0xff]   ;;  %v932_v10 = vld [vmem:[%s1275_s19 + $0x8] sm:$0xff]   ;;  %p997_p4 = scmp.ne.s32.totalorder %s1306_s10, %s996_s8  ;;  %s1088_s26 = smov [#allocation7]  }
  0x5e   : > { %813 = vmatprep.mubr.bf16.mxu0 %v930_v4  ;;  %821 = vmatprep.mubr.bf16.mxu1 %v931_v5  ;;  %v933_v11 = vld [vmem:[%s1275_s19 + $0x28] sm:$0xff]   ;;  %v934_v12 = vld [vmem:[%s1275_s19 + $0x10] sm:$0xff]   ;;  %v936_v14 = vld [vmem:[%s1275_s19 + $0x18] sm:$0xff]   ;;  %s1000_s21 = sshll.u32 %s1088_s26, 4  ;;  %s1001_s21 = int_to_ptr.vmem [resolvable:$false] %s1000_s21 }
  0x5f   : > { %v935_v13 = vld [vmem:[%s1275_s19 + $0x30] sm:$0xff]   ;;  %v937_v15 = vld [vmem:[%s1275_s19 + $0x38] sm:$0xff]   ;;  %v678_v16 = vld [vmem:[%s1366_s2] ss:$0 sm:$0xff]  ;;  %p998_p6 = pnand %p997_p4, %p1210_p10  ;;  %s1002_s4 = scalar_lea.vmem %s1001_s21, 2048 }
  0x60   : > { %800 = vmatpush3.bf16.msra.mxu0 %v923_v1  ;;  %838 = vmatpush3.bf16.msra.mxu1 %v923_v1  ;;  %p1003_p12 = scmp.lt.s32.totalorder %s1306_s10, %s1001_s21  ;;  %p1004_p11 = scmp.lt.s32.totalorder %s1002_s4, %s996_s8 }
  0x61   : > { %801 = vmatprep.subr.bf16.mxu0 %v924_v2  ;;  %831 = vmatprep.subr.bf16.mxu1 %v924_v2  ;;  %p999_p8 = pneg %p998_p6 }
  0x62   : > { %p1005_p0 = por %p1004_p11, %p1003_p12 }
  0x64   : > { %802 = vmatpush3.bf16.msra.mxu0 %v924_v2  ;;  %839 = vmatpush3.bf16.msra.mxu1 %v924_v2  ;;  %p1006_p5 = pnand %p1005_p0, %p999_p8 }
  0x65   : > { %803 = vmatprep.subr.bf16.mxu0 %v925_v3  ;;  %832 = vmatprep.subr.bf16.mxu1 %v925_v3 }
  0x68   : > { %804 = vmatpush3.bf16.msra.mxu0 %v925_v3  ;;  %840 = vmatpush3.bf16.msra.mxu1 %v925_v3 }
  0x69   : > { %805 = vmatprep.subr.bf16.mxu0 %v926_v6  ;;  %833 = vmatprep.subr.bf16.mxu1 %v926_v6 }
  0x6c   : > { %806 = vmatpush3.bf16.msra.mxu0 %v926_v6  ;;  %841 = vmatpush3.bf16.msra.mxu1 %v926_v6 }
  0x6d   : > { %807 = vmatprep.subr.bf16.mxu0 %v927_v7  ;;  %834 = vmatprep.subr.bf16.mxu1 %v927_v7 }
  0x70   : > { %808 = vmatpush3.bf16.msra.mxu0 %v927_v7  ;;  %842 = vmatpush3.bf16.msra.mxu1 %v927_v7 }
  0x71   : > { %809 = vmatprep.subr.bf16.mxu0 %v928_v8  ;;  %835 = vmatprep.subr.bf16.mxu1 %v928_v8 }
  0x74   : > { %810 = vmatpush3.bf16.msra.mxu0 %v928_v8  ;;  %843 = vmatpush3.bf16.msra.mxu1 %v928_v8 }
  0x75   : > { %811 = vmatprep.subr.bf16.mxu0 %v929_v9  ;;  %836 = vmatprep.subr.bf16.mxu1 %v929_v9 }
  0x78   : > { %812 = vmatpush3.bf16.msra.mxu0 %v929_v9  ;;  %844 = vmatpush3.bf16.msra.mxu1 %v929_v9 }
  0x7b   : > { %814 = vmatmul.mubr.bf16.vlgmr.msra.gmra.mrb[0].mxu0 %v932_v10  ;;  %822 = vmatmul.mubr.bf16.vlgmr.msra.gmra.mrb[0].mxu1 %v933_v11 }
  0x7c   : > { %817 = vmatprep.mubr.bf16.mxu0 %v934_v12  ;;  %825 = vmatprep.mubr.bf16.mxu1 %v935_v13 }
  0x83   : > { %818 = vmatmul.mubr.bf16.gmra.mrb[4].mxu0 %v936_v14  ;;  %826 = vmatmul.mubr.bf16.gmra.mrb[4].mxu1 %v937_v15 }
 0x14e   : > { %v815_v17 = vpop.f32.mrb[0].mxu0  ;;  %v823_v18 = vpop.f32.mrb[0].mxu1 }
 0x14f   : > { %v403_v19 = vadd.f32 %v815_v17, %v678_v16  ;;  %v435_v20 = vadd.f32 %v823_v18, %v678_v16  ;;  %v394_v21 = vpop.f32.mrb[1].mxu0  ;;  %v426_v22 = vpop.f32.mrb[1].mxu1 }
 0x150   : > { %v395_v23 = vadd.f32 %v678_v16, %v394_v21  ;;  %v427_v24 = vadd.f32 %v678_v16, %v426_v22  ;;  %v816_v25 = vpop.f32.mrb[2].mxu0  ;;  %v824_v26 = vpop.f32.mrb[2].mxu1 }
 0x151   : > { %v406_v27 = vadd.f32 %v816_v25, %v678_v16  ;;  %v438_v28 = vadd.f32 %v824_v26, %v678_v16  ;;  %v397_v29 = vpop.f32.mrb[3].mxu0  ;;  %v429_v30 = vpop.f32.mrb[3].mxu1  ;;  %v459_v33 = vmax.f32 %v403_v19, 0.0  ;;  %v467_v34 = vmax.f32 %v435_v20, 0.0 }
 0x152   : > { %v398_v31 = vadd.f32 %v678_v16, %v397_v29  ;;  %v430_v32 = vadd.f32 %v678_v16, %v429_v30  ;;  %v457_v37 = vmax.f32 %v395_v23, 0.0  ;;  %v465_v38 = vmax.f32 %v427_v24, 0.0 }
 0x153   : > { %v460_v35 = vmax.f32 %v406_v27, 0.0  ;;  %v468_v36 = vmax.f32 %v438_v28, 0.0 }
 0x154   : > { %v458_v39 = vmax.f32 %v398_v31, 0.0  ;;  %v466_v40 = vmax.f32 %v430_v32, 0.0 }
 0x155   : > { %v742_v41 = vpack.c.bf16 %v460_v35, %v459_v33  ;;  %v762_v42 = vpack.c.bf16 %v468_v36, %v467_v34 }
 0x156   : > { %v737_v43 = vpack.c.bf16 %v458_v39, %v457_v37  ;;  %v757_v44 = vpack.c.bf16 %v466_v40, %v465_v38  ;;  %v819_v45 = vpop.f32.mrb[4].mxu0  ;;  %v827_v46 = vpop.f32.mrb[4].mxu1 }
 0x157   : > { %774 = vst [vmem:[%s1298_s24 + $0x8] sm:$0xff] %v742_v41   ;;  %778 = vst [vmem:[%s1298_s24 + $0x28] sm:$0xff] %v762_v42   ;;  %v419_v47 = vadd.f32 %v819_v45, %v678_v16  ;;  %v451_v48 = vadd.f32 %v827_v46, %v678_v16  ;;  %v410_v49 = vpop.f32.mrb[5].mxu0  ;;  %v442_v50 = vpop.f32.mrb[5].mxu1 }
 0x158   : > { %738 = vst [vmem:[%s1298_s24] sm:$0xff] %v737_v43   ;;  %777 = vst [vmem:[%s1298_s24 + $0x20] sm:$0xff] %v757_v44   ;;  %v411_v51 = vadd.f32 %v678_v16, %v410_v49  ;;  %v443_v52 = vadd.f32 %v678_v16, %v442_v50  ;;  %v820_v53 = vpop.f32.mrb[6].mxu0  ;;  %v828_v54 = vpop.f32.mrb[6].mxu1 }
 0x159   : > { %v422_v55 = vadd.f32 %v820_v53, %v678_v16  ;;  %v454_v56 = vadd.f32 %v828_v54, %v678_v16  ;;  %v413_v57 = vpop.f32.mrb[7].mxu0  ;;  %v445_v58 = vpop.f32.mrb[7].mxu1  ;;  %v463_v61 = vmax.f32 %v419_v47, 0.0  ;;  %v471_v62 = vmax.f32 %v451_v48, 0.0 }
 0x15a   : > { %v414_v59 = vadd.f32 %v678_v16, %v413_v57  ;;  %v446_v60 = vadd.f32 %v678_v16, %v445_v58  ;;  %v461_v1 = vmax.f32 %v411_v51, 0.0  ;;  %v469_v2 = vmax.f32 %v443_v52, 0.0 }
 0x15b   : > { %v464_v63 = vmax.f32 %v422_v55, 0.0  ;;  %v472_v0 = vmax.f32 %v454_v56, 0.0 }
 0x15c   : > { %v462_v3 = vmax.f32 %v414_v59, 0.0  ;;  %v470_v4 = vmax.f32 %v446_v60, 0.0 }
 0x15d   : > { %v752_v5 = vpack.c.bf16 %v464_v63, %v463_v61  ;;  %v772_v6 = vpack.c.bf16 %v472_v0, %v471_v62 }
 0x15e   : > { %v747_v7 = vpack.c.bf16 %v462_v3, %v461_v1  ;;  %v767_v8 = vpack.c.bf16 %v470_v4, %v469_v2 }
 0x15f   : > { %776 = vst [vmem:[%s1298_s24 + $0x18] sm:$0xff] %v752_v5   ;;  %780 = vst [vmem:[%s1298_s24 + $0x38] sm:$0xff] %v772_v6  }
 0x160   : > { %775 = vst [vmem:[%s1298_s24 + $0x10] sm:$0xff] %v747_v7   ;;  %779 = vst [vmem:[%s1298_s24 + $0x30] sm:$0xff] %v767_v8  }
 0x161   : > { %1009 = shalt.err (!%p1006_p5)
}
 0x162   : > { %s1010_s6 = scalar_lea.hbm %s1311_s18, 1024  ;;  %s1014_s19 = scalar_lea.hbm %s1367_s3, 2048 }
 0x163   : > { %p1011_p9 = scmp.ne.s32.totalorder %s1311_s18, %s1010_s6  ;;  %p1015_p3 = scmp.lt.u32.totalorder %s1311_s18, %s1367_s3 }
 0x164   : > { %p1016_p7 = scmp.lt.u32.totalorder %s1014_s19, %s1010_s6  ;;  %p1018_p4 = scmp.lt.u32.totalorder %s1010_s6, %s1311_s18 }
 0x165   : > { %p1012_p1 = pnand %p1011_p9, %p1210_p10 }
 0x166   : > { %p1017_p13 = por %p1016_p7, %p1015_p3 }
 0x167   : > { %p1013_p2 = pneg %p1012_p1 }
 0x168   : > { %p1019_p6 = por %p1018_p4, %p1017_p13 }
 0x16a   : > { %p1020_p8 = pnand %p1019_p6, %p1013_p2 }
 0x16c   : > { %1023 = shalt.err (!%p1020_p8)
}
 0x16d   : > { %s1089_s24 = smov 64   ;;  %s1090_s11 = smov 4  }
 0x16e   : > { %851 = dma.vmem_to_hbm [thread:$0]  (%p1210_p10), %s1306_s10, 1024, %s1311_s18, %s554_s25, %s1089_s24, %s1089_s24, %s1090_s11  }
 0x16f PF: > { %s584_s15 = sand.u32 1, %s1062_s12   ;;  %p1385_p12 = scmp.ne.s32.totalorder %s1375_s23, 0 }
 0x170   : > { %p1386_p11 = scmp.ge.s32.totalorder %s1082_s17, 2  ;;  %s585_s9 = scalar_lea.sflag [#allocation4], %s584_s15 }
 0x172   : > { %p862_p0 = pnand %p1386_p11, %p1385_p12 }
 0x174   : > { %1057 = dma.done.wait (!%p862_p0), %s585_s9, 1024  }
 0x175   : > { %1059 = vsyncadd (!%p862_p0), %s585_s9, 4294966272  ;;  %s20_s17 = sadd.s32 1, %s1082_s17   ;;  %s1387_s12 = smov %s1066_s13 }
 0x176   : > { %p17_p5 = scmp.ge.s32.totalorder %s20_s17, 4   ;;  %s1388_s13 = smov %s1070_s14 }
 0x177   : > { %s1389_s14 = smov %s1219_s5  ;;  %s1390_s15 = smov %s1078_s16 }
 0x178   : > { %s1391_s16 = smov %s1393_s28  ;;  %19 = sbr.rel (!%p17_p5) target bundleno = 7 (0x7), region = 81 }
 0x17f   :  { %590 = vsyncpa [#allocation3], 1 }
 0x180   :  { %592 = vsyncpa [#allocation3 + $0x1], 1 }
 0x181   :  { %593 = vsyncpa [#allocation6], 1 }
 0x182   :  { %594 = vsyncpa [#allocation4], 1 }
 0x183   :  { %596 = vsyncpa [#allocation4 + $0x1], 1 }

</bundles_post_ra>
